<compile_context>
chip_gen: v6e
topology: v6e:2x2x1
jax: 0.10.0
libtpu: 0.0.40
codegen_flags: <defaults>
</compile_context>

<pallas_src>
import math

import jax
import jax.numpy as jnp
from jax.experimental import pallas as pl
from jax.experimental.pallas import tpu as pltpu

_LANE = 128
_PALLAS_MIN_ELEMS = 64 * 1024          # below this, a fused XLA multiply is faster
_TARGET_BLOCK_BYTES = 1 << 20          # ~1 MiB per pipelined block


def _scale_kernel(scale_ref, x_ref, o_ref):
    # o = x * scale ; multiply in f32, cast back to the output dtype.
    o_ref[...] = (x_ref[...].astype(jnp.float32) * scale_ref[0]).astype(o_ref.dtype)


def _pick_width(n):
    """Largest lane-dense last dim (multiple of 128) that divides n exactly."""
    for w in (1024, 512, 256, _LANE):
        if n % w == 0:
            return w
    return None


def _tile_rows(rows, width, itemsize):
    """Rows per block: ~1 MiB per buffer, aligned to the dtype's sublane packing."""
    sublane = max(8, 32 // max(1, itemsize))          # 8 f32, 16 bf16, 32 int8
    target = max(sublane, _TARGET_BLOCK_BYTES // (width * itemsize))
    tile = max(sublane, (target // sublane) * sublane)
    if tile >= rows:
        return rows                                   # single full-extent block
    return tile


def _scale_by(x, scale):
    """Elementwise out = x * scale via a tiled Pallas kernel (scale: Python float)."""
    n = x.size
    if n == 0:
        return x
    if n < _PALLAS_MIN_ELEMS:
        # Tiny tensors: per-call overhead dwarfs the work; use plain XLA.
        return (x.astype(jnp.float32) * jnp.float32(scale)).astype(x.dtype)

    width = _pick_width(n)
    if width is None:
        # TODO(synk): total element count not a multiple of 128 lanes; falling
        # back to a fused XLA multiply instead of a masked ragged-tail kernel.
        return (x.astype(jnp.float32) * jnp.float32(scale)).astype(x.dtype)

    rows = n // width
    x2 = x.reshape(rows, width)
    itemsize = jnp.dtype(x.dtype).itemsize
    tile_r = _tile_rows(rows, width, itemsize)
    grid = (pl.cdiv(rows, tile_r),)

    scale_arr = jnp.full((1,), scale, dtype=jnp.float32)

    out2 = pl.pallas_call(
        _scale_kernel,
        out_shape=jax.ShapeDtypeStruct((rows, width), x.dtype),
        grid=grid,
        in_specs=[
            pl.BlockSpec(memory_space=pltpu.MemorySpace.SMEM),   # scalar scale
            pl.BlockSpec((tile_r, width), lambda i: (i, 0)),     # gradient tile
        ],
        out_specs=pl.BlockSpec((tile_r, width), lambda i: (i, 0)),
        input_output_aliases={1: 0},   # grad buffer may be reused in place
        compiler_params=pltpu.CompilerParams(
            dimension_semantics=("parallel",)),
    )(scale_arr, x2)

    return out2.reshape(x.shape)


# ---- GradientReverseFunction equivalent (custom VJP) -----------------------

def _gradient_reverse_impl(x, coeff):
    # Forward: identity (== input * 1.0). No kernel, no memory traffic.
    return x


gradient_reverse = jax.custom_vjp(_gradient_reverse_impl, nondiff_argnums=(1,))


def _gr_fwd(x, coeff):
    return x, None


def _gr_bwd(coeff, _res, g):
    # Backward: grad_input = -coeff * grad_output via the Pallas scale kernel.
    return (_scale_by(g, -float(coeff)),)


gradient_reverse.defvjp(_gr_fwd, _gr_bwd)


# ---- WarmStartGradientReverseLayer equivalent ------------------------------

def _warm_start_coeff(alpha, lo, hi, iter_num, max_iters):
    return float(
        2.0 * (hi - lo) / (1.0 + math.exp(-alpha * iter_num / max_iters))
        - (hi - lo) + lo
    )


class WarmStartGradientReverseLayer:
    # Note: iter_num is host-side Python state (like the PyTorch module); it is
    # frozen if __call__ is traced under jax.jit with auto_step=True.
    def __init__(self, alpha=1.0, lo=0.0, hi=1.0, max_iters=1000.0,
                 auto_step=False):
        self.alpha = alpha
        self.lo = lo
        self.hi = hi
        self.iter_num = 0
        self.max_iters = max_iters
        self.auto_step = auto_step

    def __call__(self, x):
        coeff = _warm_start_coeff(self.alpha, self.lo, self.hi,
                                  self.iter_num, self.max_iters)
        if self.auto_step:
            self.step()
        return gradient_reverse(x, coeff)

    def step(self):
        self.iter_num += 1


if __name__ == "__main__":
    key = jax.random.PRNGKey(0)
    k1, k2 = jax.random.split(key)

    # Small NCHW input matching the PyTorch module's typical usage.
    x = jax.random.normal(k1, (2, 4, 16, 16), dtype=jnp.float32)

    layer = WarmStartGradientReverseLayer(alpha=1.0, lo=0.0, hi=1.0,
                                          max_iters=1000.0, auto_step=True)

    # Forward pass (identity).
    y = jax.block_until_ready(layer(x))
    assert y.shape == x.shape and y.dtype == x.dtype
    assert jnp.array_equal(y, x), "forward must be identity"

    # Gradient-reversal semantics at iter_num=1 (small tensor -> XLA fast path).
    coeff1 = _warm_start_coeff(1.0, 0.0, 1.0, 1, 1000.0)
    g_small = jax.block_until_ready(
        jax.grad(lambda inp: jnp.sum(gradient_reverse(inp, coeff1)))(x))
    assert jnp.allclose(g_small, jnp.full_like(x, -coeff1), rtol=1e-6, atol=1e-6)

    # Larger input that exercises the tiled Pallas backward kernel (grid > 1).
    x_big = jax.random.normal(k2, (1024, 1024), dtype=jnp.float32)
    expected_direct = x_big * jnp.float32(-coeff1)

    g_big = jax.block_until_ready(
        jax.grad(lambda inp: jnp.sum(gradient_reverse(inp, coeff1)))(x_big))
    assert g_big.shape == x_big.shape and g_big.dtype == x_big.dtype
    assert jnp.allclose(g_big, jnp.full_like(x_big, -coeff1), rtol=1e-6, atol=1e-6)

    # Direct check of the Pallas scale kernel itself.
    got = jax.block_until_ready(_scale_by(x_big, -coeff1))
    assert jnp.allclose(got, expected_direct, rtol=1e-6, atol=1e-6)

    print("KERNEL_OK")
</pallas_src>

<mosaic_0001>
module attributes {stable_mosaic.version = 11 : i64} {
  func.func @_scale_kernel(%arg0: i32, %arg1: memref<1xf32, #tpu.memory_space<smem>>, %arg2: memref<256x1024xf32, #tpu.memory_space<vmem>>, %arg3: memref<256x1024xf32, #tpu.memory_space<vmem>>) attributes {dimension_semantics = [#tpu.dimension_semantics<parallel>], iteration_bounds = array<i64: 4>, scalar_prefetch = 0 : i64, scratch_operands = 0 : i64, tpu.core_type = #tpu.core_type<tc>, window_params = [{transform_indices = @transform_0, window_bounds = array<i64: 1>}, {transform_indices = @transform_1, window_bounds = array<i64: 256, 1024>}, {transform_indices = @transform_2, window_bounds = array<i64: 256, 1024>}]} {
    %c0 = arith.constant 0 : index
    %c0_0 = arith.constant 0 : index
    %0 = vector.load %arg2[%c0, %c0_0] : memref<256x1024xf32, #tpu.memory_space<vmem>>, vector<256x1024xf32>
    %c0_1 = arith.constant 0 : index
    %1 = memref.load %arg1[%c0_1] : memref<1xf32, #tpu.memory_space<smem>>
    %2 = vector.broadcast %1 : f32 to vector<256x1024xf32>
    %3 = arith.mulf %0, %2 : vector<256x1024xf32>
    %c0_2 = arith.constant 0 : index
    %c0_3 = arith.constant 0 : index
    %4 = vector.load %arg3[%c0_2, %c0_3] : memref<256x1024xf32, #tpu.memory_space<vmem>>, vector<256x1024xf32>
    tpu.vector_store %arg3[%c0_2, %c0_3], %3 {strides = array<i32>} : memref<256x1024xf32, #tpu.memory_space<vmem>>, vector<256x1024xf32>,
    return
  }
  func.func @transform_0(%arg0: i32) -> i32 {
    %c0_i32 = arith.constant 0 : i32
    %c0_i32_0 = arith.constant 0 : i32
    return %c0_i32 : i32
  }
  func.func @transform_1(%arg0: i32) -> (i32, i32) {
    %c0_i32 = arith.constant 0 : i32
    %c0_i32_0 = arith.constant 0 : i32
    return %arg0, %c0_i32 : i32, i32
  }
  func.func @transform_2(%arg0: i32) -> (i32, i32) {
    %c0_i32 = arith.constant 0 : i32
    %c0_i32_0 = arith.constant 0 : i32
    return %arg0, %c0_i32 : i32, i32
  }
}

</mosaic_0001>

<bundles_post_ra>
// kernel: tpu_custom_call.1
= control target key start
LH: loop header
LB: loop body
LE: loop exit
PB: predicated region body
PF: predicated region fallthrough
CT: control target
= control target key end

     0   :  { %s2139_s0 = inlined_call_operand.<no memory space> [shape: f32[1], index: 0, kind: input, shape index: {}]   ;;  %s2140_s1 = inlined_call_operand.hbm [shape: f32[1024,1024], index: 1, kind: input, shape index: {}, may-alias: {1,2}]   ;;  %s2141_s2 = inlined_call_operand.hbm [shape: f32[1024,1024], index: 2, kind: output, shape index: {}, may-alias: {1,2}]  }
   0x1   :  { %7 = sst [smem:[#allocation2]] %s2139_s0 }
   0x2   :  { %8 = vsyncpa [#allocation4], 0 }
   0x3   :  { %10 = vsyncpa [#allocation4 + $0x1], 0 }
   0x4   :  { %11 = vsyncpa [#allocation5], 0 }
   0x5   :  { %13 = vsyncpa [#allocation5 + $0x1], 0  ;;  %s1212_s11 = smov 0   ;;  %s1214_s12 = smov 0  }
   0x6   :  { %s1216_s13 = smov 0   ;;  %s1218_s14 = smov 0  }
   0x7 LB: > { %s1233_s0 = sadd.s32 4294967295, %s1186_s14   ;;  %s1024_s15 = sadd.s32 4294967294, %s1186_s14   ;;  %s1186_s14 = sphi %s1218_s14, %s2155_s14   ;;  %s1182_s13 = sphi %s1216_s13, %s2154_s13   ;;  %s1178_s12 = sphi %s1214_s12, %s2153_s12   ;;  %s1174_s11 = sphi %s1212_s11, %s2152_s11  }
   0x8   : > { %s1237_s16 = sadd.s32 1, %s1186_s14   ;;  %s47_s17 = sadd.s32 1, %s1182_s13 }
   0x9   : > { %s44_s18 = ssub.s32 %s1186_s14, %s1237_s16  ;;  %p54_p0 = scmp.ne.s32.totalorder %s1182_s13, %s1178_s12 }
   0xa   : > { %p45_p1 = scmp.eq.s32.totalorder %s44_s18, 0  ;;  %p55_p2 = scmp.eq.s32.totalorder %s1186_s14, 0 }
   0xb   : > { %p60_p3 = scmp.ne.s32.totalorder %s1178_s12, %s1174_s11  ;;  %p61_p4 = scmp.eq.s32.totalorder %s1233_s0, 0 }
   0xc   : > { %s1249_s19 = scalar_select %p45_p1, %s1182_s13, %s47_s17  }
   0xd   : > { %p1251_p5 = por %p55_p2, %p54_p0  ;;  %p1255_p6 = por %p61_p4, %p60_p3 }
   0xe   : > { %p84_p7 = scmp.eq.s32.totalorder %s1233_s0, 3  ;;  %p90_p8 = scmp.eq.s32.totalorder %s1024_s15, 3 }
   0xf   : > { %s2145_s21 = scalar_select %p1255_p6, 1, 0 }
  0x10   : > { %p1056_p9 = scmp.lt.s32.totalorder %s1186_s14, 4  ;;  %p1261_p10 = por %p84_p7, %p54_p0 }
  0x11   : > { %p1265_p11 = por %p90_p8, %p60_p3  ;;  %s113_s24 = sand.u32 1, %s1182_s13  }
  0x12   : > { %s2146_s22 = scalar_select %p1261_p10, 1, 0 }
  0x13   : > { %s2147_s23 = scalar_select %p1265_p11, 1, 0 }
  0x14   : > { %s1041_s25 = sshll.u32 %s1186_s14, 15  ;;  %s1027_s26 = sshll.u32 %s113_s24, 11 }
  0x15   : > { %s1274_s29 = scalar_lea.hbm %s2140_s1, %s1041_s25  ;;  %s117_s30 = scalar_lea.vmem [#allocation3], %s1027_s26 }
  0x16   : > { %s125_s3 = sshll.u32 %s117_s30, 4  ;;  %p1278_p12 = pnand %p1056_p9, %p1251_p5  ;;  %s1282_s3 = int_to_ptr.vmem [resolvable:$true] %s125_s3 }
  0x17   : > { %s1284_s5 = scalar_lea.sflag [#allocation4], %s113_s24  ;;  %s1094_s6 = scalar_lea.hbm %s1274_s29, 32768 }
  0x18   : > { %p1095_p13 = scmp.ne.s32.totalorder %s1274_s29, %s1094_s6  ;;  %p1096_p0 = pneg %p1278_p12 }
  0x19   : > { %s1099_s9 = scalar_lea.hbm %s2140_s1, 131072  ;;  %p1100_p3 = scmp.lt.s32.totalorder %s1274_s29, %s2140_s1 }
  0x1a   : > { %p1097_p1 = pnand %p1096_p0, %p1095_p13  ;;  %p1101_p4 = scmp.lt.s32.totalorder %s1099_s9, %s1094_s6 }
  0x1c   : > { %p1098_p2 = pneg %p1097_p1  ;;  %p1102_p5 = por %p1101_p4, %p1100_p3 }
  0x1e   : > { %p1103_p7 = pnand %p1102_p5, %p1098_p2 }
  0x20   : > { %1106 = shalt.err (!%p1103_p7)
}
  0x21   : > { %s1107_s17 = scalar_lea.vmem %s1282_s3, 32768  ;;  %s1188_s18 = smov [#allocation3]  }
  0x22   : > { %p1108_p8 = scmp.ne.s32.totalorder %s1282_s3, %s1107_s17  ;;  %s1112_s20 = sshll.u32 %s1188_s18, 4  ;;  %s1113_s20 = int_to_ptr.vmem [resolvable:$false] %s1112_s20 }
  0x23   : > { %s1114_s24 = scalar_lea.vmem %s1113_s20, 65536  ;;  %p1115_p1 = scmp.lt.s32.totalorder %s1282_s3, %s1113_s20 }
  0x24   : > { %p1110_p9 = pnand %p1108_p8, %p1096_p0  ;;  %p1116_p11 = scmp.lt.s32.totalorder %s1114_s24, %s1107_s17 }
  0x26   : > { %p1111_p13 = pneg %p1110_p9  ;;  %p1117_p10 = por %p1116_p11, %p1115_p1 }
  0x28   : > { %p1118_p6 = pnand %p1117_p10, %p1111_p13 }
  0x2a   : > { %1121 = shalt.err (!%p1118_p6)
}
  0x2b   : > { %s1189_s25 = smov 1024   ;;  %s1190_s26 = smov 64  }
  0x2c   : > { %1051 = dma.hbm_to_vmem [thread:$0]  (!%p1278_p12), %s1274_s29, 32768, %s1282_s3, %s1284_s5, %s1189_s25, %s1189_s25, %s1190_s26  }
  0x2d   : > { %p1031_p0 = scmp.ge.s32.totalorder %s1186_s14, 1  ;;  %p133_p2 = scmp.lt.s32.totalorder %s1186_s14, 5 }
  0x2f   : > { %p134_p3 = pnand %p1031_p0, %p133_p2 }
  0x30   : > { %s1308_s27 = sand.u32 (!%p134_p3), 1, %s1178_s12   ;;  %p2149_p6 = scmp.ne.s32.totalorder (!%p134_p3), %s2145_s21, 0 }
  0x31   : > { %137 = sbr.rel (%p134_p3) target bundleno = 205 (0xcd), region = 28  ;;  %s1032_s28 = sshll.u32 (!%p134_p3), %s1308_s27, 11 }
  0x32   : > { %s140_s30 = scalar_lea.sflag (!%p134_p3), [#allocation4], %s1308_s27  ;;  %s1312_s6 = scalar_lea.vmem (!%p134_p3), [#allocation3], %s1032_s28 }
  0x36   : > { %1165 = dma.done.wait (%p2149_p6), %s140_s30, 32768  }
  0x37   : > { %1167 = vsyncadd (%p2149_p6), %s140_s30, 4294934528  ;;  %s422_s29 = sld [smem:[#allocation2]]  ;;  %v166_v0 = vld [vmem:[%s1312_s6] sm:$0xff]  ;;  %v167_v2 = vld [vmem:[%s1312_s6 + $0x8] sm:$0xff]  ;;  %s1335_s21 = scalar_lea.vmem [#allocation6], %s1032_s28 }
  0x38   : > { %v168_v3 = vld [vmem:[%s1312_s6 + $0x10] sm:$0xff]  ;;  %v169_v7 = vld [vmem:[%s1312_s6 + $0x18] sm:$0xff]  ;;  %v170_v8 = vld [vmem:[%s1312_s6 + $0x20] sm:$0xff]  ;;  %s1043_s3 = sshll.u32 %s1233_s0, 15  ;;  %s951_s4 = sshll.u32 %s1335_s21, 4  ;;  %s2089_s4 = int_to_ptr.vmem [resolvable:$true] %s951_s4 }
  0x39   : > { %v171_v9 = vld [vmem:[%s1312_s6 + $0x28] sm:$0xff]  ;;  %v172_v13 = vld [vmem:[%s1312_s6 + $0x30] sm:$0xff]  ;;  %v173_v14 = vld [vmem:[%s1312_s6 + $0x38] sm:$0xff]  ;;  %s2087_s7 = scalar_lea.hbm %s2141_s2, %s1043_s3  ;;  %s937_s8 = scalar_lea.sflag [#allocation5], %s1308_s27 }
  0x3a   : > { %v174_v15 = vld [vmem:[%s1312_s6 + $0x40] sm:$0xff]  ;;  %v175_v19 = vld [vmem:[%s1312_s6 + $0x48] sm:$0xff]  ;;  %v176_v20 = vld [vmem:[%s1312_s6 + $0x50] sm:$0xff]  ;;  %s1122_s9 = scalar_lea.vmem %s2089_s4, 32768  ;;  %p2150_p11 = scmp.ne.s32.totalorder %s2146_s22, 0 }
  0x3b   : > { %v177_v21 = vld [vmem:[%s1312_s6 + $0x58] sm:$0xff]  ;;  %v178_v25 = vld [vmem:[%s1312_s6 + $0x60] sm:$0xff]  ;;  %v179_v26 = vld [vmem:[%s1312_s6 + $0x68] sm:$0xff]  ;;  %p1123_p10 = scmp.ne.s32.totalorder %s2089_s4, %s1122_s9  ;;  %s1191_s10 = smov [#allocation6]  }
  0x3c   : > { %v180_v27 = vld [vmem:[%s1312_s6 + $0x70] sm:$0xff]  ;;  %v181_v31 = vld [vmem:[%s1312_s6 + $0x78] sm:$0xff]  ;;  %v182_v32 = vld [vmem:[%s1312_s6 + $0x80] sm:$0xff]  ;;  %s1126_s15 = sshll.u32 %s1191_s10, 4  ;;  %s1127_s15 = int_to_ptr.vmem [resolvable:$false] %s1126_s15 }
  0x3d   : > { %v1319_v1 = vstv %s422_s29  ;;  %v183_v33 = vld [vmem:[%s1312_s6 + $0x88] sm:$0xff]  ;;  %v184_v37 = vld [vmem:[%s1312_s6 + $0x90] sm:$0xff]  ;;  %v185_v38 = vld [vmem:[%s1312_s6 + $0x98] sm:$0xff]  ;;  %p1124_p12 = pnand %p1123_p10, %p2150_p11  ;;  %s1128_s17 = scalar_lea.vmem %s1127_s15, 65536 }
  0x3e   : > { %v424_v4 = vmul.f32 %v1319_v1, %v166_v0  ;;  %v425_v5 = vmul.f32 %v1319_v1, %v167_v2  ;;  %v426_v6 = vmul.f32 %v1319_v1, %v168_v3  ;;  %v427_v10 = vmul.f32 %v1319_v1, %v169_v7  ;;  %v186_v39 = vld [vmem:[%s1312_s6 + $0xa0] sm:$0xff]  ;;  %v187_v43 = vld [vmem:[%s1312_s6 + $0xa8] sm:$0xff]  ;;  %v188_v44 = vld [vmem:[%s1312_s6 + $0xb0] sm:$0xff]  ;;  %p1129_p5 = scmp.lt.s32.totalorder %s2089_s4, %s1127_s15  ;;  %p1130_p7 = scmp.lt.s32.totalorder %s1128_s17, %s1122_s9 }
  0x3f   : > { %v428_v11 = vmul.f32 %v1319_v1, %v170_v8  ;;  %v429_v12 = vmul.f32 %v1319_v1, %v171_v9  ;;  %v430_v16 = vmul.f32 %v1319_v1, %v172_v13  ;;  %v431_v17 = vmul.f32 %v1319_v1, %v173_v14  ;;  %v189_v45 = vld [vmem:[%s1312_s6 + $0xb8] sm:$0xff]  ;;  %v190_v49 = vld [vmem:[%s1312_s6 + $0xc0] sm:$0xff]  ;;  %v191_v50 = vld [vmem:[%s1312_s6 + $0xc8] sm:$0xff]  ;;  %p1125_p4 = pneg %p1124_p12 }
  0x40   : > { %680 = vst [vmem:[%s1335_s21] sm:$0xff] %v424_v4  ;;  %681 = vst [vmem:[%s1335_s21 + $0x8] sm:$0xff] %v425_v5  ;;  %v432_v18 = vmul.f32 %v1319_v1, %v174_v15  ;;  %v433_v22 = vmul.f32 %v1319_v1, %v175_v19  ;;  %v434_v23 = vmul.f32 %v1319_v1, %v176_v20  ;;  %v192_v51 = vld [vmem:[%s1312_s6 + $0xd0] sm:$0xff]  ;;  %v193_v55 = vld [vmem:[%s1312_s6 + $0xd8] sm:$0xff]  ;;  %p1131_p8 = por %p1130_p7, %p1129_p5 }
  0x41   : > { %682 = vst [vmem:[%s1335_s21 + $0x10] sm:$0xff] %v426_v6  ;;  %683 = vst [vmem:[%s1335_s21 + $0x18] sm:$0xff] %v427_v10  ;;  %v435_v24 = vmul.f32 %v1319_v1, %v177_v21  ;;  %v436_v28 = vmul.f32 %v1319_v1, %v178_v25  ;;  %v437_v29 = vmul.f32 %v1319_v1, %v179_v26  ;;  %v194_v56 = vld [vmem:[%s1312_s6 + $0xe0] sm:$0xff]  ;;  %v195_v57 = vld [vmem:[%s1312_s6 + $0xe8] sm:$0xff] }
  0x42   : > { %684 = vst [vmem:[%s1335_s21 + $0x20] sm:$0xff] %v428_v11  ;;  %685 = vst [vmem:[%s1335_s21 + $0x28] sm:$0xff] %v429_v12  ;;  %v438_v30 = vmul.f32 %v1319_v1, %v180_v27  ;;  %v439_v34 = vmul.f32 %v1319_v1, %v181_v31  ;;  %v440_v35 = vmul.f32 %v1319_v1, %v182_v32  ;;  %v196_v61 = vld [vmem:[%s1312_s6 + $0xf0] sm:$0xff]  ;;  %v197_v62 = vld [vmem:[%s1312_s6 + $0xf8] sm:$0xff]  ;;  %p1132_p9 = pnand %p1131_p8, %p1125_p4 }
  0x43   : > { %686 = vst [vmem:[%s1335_s21 + $0x30] sm:$0xff] %v430_v16  ;;  %687 = vst [vmem:[%s1335_s21 + $0x38] sm:$0xff] %v431_v17  ;;  %v441_v36 = vmul.f32 %v1319_v1, %v183_v33  ;;  %v442_v40 = vmul.f32 %v1319_v1, %v184_v37  ;;  %v443_v41 = vmul.f32 %v1319_v1, %v185_v38  ;;  %v198_v63 = vld [vmem:[%s1312_s6 + $0x100] sm:$0xff]  ;;  %v199_v4 = vld [vmem:[%s1312_s6 + $0x108] sm:$0xff] }
  0x44   : > { %688 = vst [vmem:[%s1335_s21 + $0x40] sm:$0xff] %v432_v18  ;;  %689 = vst [vmem:[%s1335_s21 + $0x48] sm:$0xff] %v433_v22  ;;  %v444_v42 = vmul.f32 %v1319_v1, %v186_v39  ;;  %v445_v46 = vmul.f32 %v1319_v1, %v187_v43  ;;  %v446_v47 = vmul.f32 %v1319_v1, %v188_v44  ;;  %v200_v5 = vld [vmem:[%s1312_s6 + $0x110] sm:$0xff]  ;;  %v201_v6 = vld [vmem:[%s1312_s6 + $0x118] sm:$0xff] }
  0x45   : > { %690 = vst [vmem:[%s1335_s21 + $0x50] sm:$0xff] %v434_v23  ;;  %691 = vst [vmem:[%s1335_s21 + $0x58] sm:$0xff] %v435_v24  ;;  %v447_v48 = vmul.f32 %v1319_v1, %v189_v45  ;;  %v448_v52 = vmul.f32 %v1319_v1, %v190_v49  ;;  %v449_v53 = vmul.f32 %v1319_v1, %v191_v50  ;;  %v202_v10 = vld [vmem:[%s1312_s6 + $0x120] sm:$0xff]  ;;  %v203_v11 = vld [vmem:[%s1312_s6 + $0x128] sm:$0xff] }
  0x46   : > { %692 = vst [vmem:[%s1335_s21 + $0x60] sm:$0xff] %v436_v28  ;;  %693 = vst [vmem:[%s1335_s21 + $0x68] sm:$0xff] %v437_v29  ;;  %v450_v54 = vmul.f32 %v1319_v1, %v192_v51  ;;  %v451_v58 = vmul.f32 %v1319_v1, %v193_v55  ;;  %v452_v59 = vmul.f32 %v1319_v1, %v194_v56  ;;  %v204_v12 = vld [vmem:[%s1312_s6 + $0x130] sm:$0xff]  ;;  %v205_v16 = vld [vmem:[%s1312_s6 + $0x138] sm:$0xff] }
  0x47   : > { %694 = vst [vmem:[%s1335_s21 + $0x70] sm:$0xff] %v438_v30  ;;  %695 = vst [vmem:[%s1335_s21 + $0x78] sm:$0xff] %v439_v34  ;;  %v453_v60 = vmul.f32 %v1319_v1, %v195_v57  ;;  %v454_v0 = vmul.f32 %v1319_v1, %v196_v61  ;;  %v455_v2 = vmul.f32 %v1319_v1, %v197_v62  ;;  %v206_v17 = vld [vmem:[%s1312_s6 + $0x140] sm:$0xff]  ;;  %v207_v18 = vld [vmem:[%s1312_s6 + $0x148] sm:$0xff] }
  0x48   : > { %696 = vst [vmem:[%s1335_s21 + $0x80] sm:$0xff] %v440_v35  ;;  %697 = vst [vmem:[%s1335_s21 + $0x88] sm:$0xff] %v441_v36  ;;  %v456_v3 = vmul.f32 %v1319_v1, %v198_v63  ;;  %v457_v7 = vmul.f32 %v1319_v1, %v199_v4  ;;  %v458_v8 = vmul.f32 %v1319_v1, %v200_v5  ;;  %v208_v22 = vld [vmem:[%s1312_s6 + $0x150] sm:$0xff]  ;;  %v209_v23 = vld [vmem:[%s1312_s6 + $0x158] sm:$0xff] }
  0x49   : > { %698 = vst [vmem:[%s1335_s21 + $0x90] sm:$0xff] %v442_v40  ;;  %699 = vst [vmem:[%s1335_s21 + $0x98] sm:$0xff] %v443_v41  ;;  %v459_v9 = vmul.f32 %v1319_v1, %v201_v6  ;;  %v460_v13 = vmul.f32 %v1319_v1, %v202_v10  ;;  %v461_v14 = vmul.f32 %v1319_v1, %v203_v11  ;;  %v210_v24 = vld [vmem:[%s1312_s6 + $0x160] sm:$0xff]  ;;  %v211_v28 = vld [vmem:[%s1312_s6 + $0x168] sm:$0xff] }
  0x4a   : > { %700 = vst [vmem:[%s1335_s21 + $0xa0] sm:$0xff] %v444_v42  ;;  %701 = vst [vmem:[%s1335_s21 + $0xa8] sm:$0xff] %v445_v46  ;;  %v462_v15 = vmul.f32 %v1319_v1, %v204_v12  ;;  %v463_v19 = vmul.f32 %v1319_v1, %v205_v16  ;;  %v464_v20 = vmul.f32 %v1319_v1, %v206_v17  ;;  %v212_v29 = vld [vmem:[%s1312_s6 + $0x170] sm:$0xff]  ;;  %v213_v30 = vld [vmem:[%s1312_s6 + $0x178] sm:$0xff] }
  0x4b   : > { %702 = vst [vmem:[%s1335_s21 + $0xb0] sm:$0xff] %v446_v47  ;;  %703 = vst [vmem:[%s1335_s21 + $0xb8] sm:$0xff] %v447_v48  ;;  %v465_v21 = vmul.f32 %v1319_v1, %v207_v18  ;;  %v466_v25 = vmul.f32 %v1319_v1, %v208_v22  ;;  %v467_v26 = vmul.f32 %v1319_v1, %v209_v23  ;;  %v214_v34 = vld [vmem:[%s1312_s6 + $0x180] sm:$0xff]  ;;  %v215_v35 = vld [vmem:[%s1312_s6 + $0x188] sm:$0xff] }
  0x4c   : > { %704 = vst [vmem:[%s1335_s21 + $0xc0] sm:$0xff] %v448_v52  ;;  %705 = vst [vmem:[%s1335_s21 + $0xc8] sm:$0xff] %v449_v53  ;;  %v468_v27 = vmul.f32 %v1319_v1, %v210_v24  ;;  %v469_v31 = vmul.f32 %v1319_v1, %v211_v28  ;;  %v470_v32 = vmul.f32 %v1319_v1, %v212_v29  ;;  %v216_v36 = vld [vmem:[%s1312_s6 + $0x190] sm:$0xff]  ;;  %v217_v40 = vld [vmem:[%s1312_s6 + $0x198] sm:$0xff] }
  0x4d   : > { %706 = vst [vmem:[%s1335_s21 + $0xd0] sm:$0xff] %v450_v54  ;;  %707 = vst [vmem:[%s1335_s21 + $0xd8] sm:$0xff] %v451_v58  ;;  %v471_v33 = vmul.f32 %v1319_v1, %v213_v30  ;;  %v472_v37 = vmul.f32 %v1319_v1, %v214_v34  ;;  %v473_v38 = vmul.f32 %v1319_v1, %v215_v35  ;;  %v218_v41 = vld [vmem:[%s1312_s6 + $0x1a0] sm:$0xff]  ;;  %v219_v42 = vld [vmem:[%s1312_s6 + $0x1a8] sm:$0xff] }
  0x4e   : > { %708 = vst [vmem:[%s1335_s21 + $0xe0] sm:$0xff] %v452_v59  ;;  %709 = vst [vmem:[%s1335_s21 + $0xe8] sm:$0xff] %v453_v60  ;;  %v474_v39 = vmul.f32 %v1319_v1, %v216_v36  ;;  %v475_v43 = vmul.f32 %v1319_v1, %v217_v40  ;;  %v476_v44 = vmul.f32 %v1319_v1, %v218_v41  ;;  %v220_v46 = vld [vmem:[%s1312_s6 + $0x1b0] sm:$0xff]  ;;  %v221_v47 = vld [vmem:[%s1312_s6 + $0x1b8] sm:$0xff] }
  0x4f   : > { %710 = vst [vmem:[%s1335_s21 + $0xf0] sm:$0xff] %v454_v0  ;;  %711 = vst [vmem:[%s1335_s21 + $0xf8] sm:$0xff] %v455_v2  ;;  %v477_v45 = vmul.f32 %v1319_v1, %v219_v42  ;;  %v222_v48 = vld [vmem:[%s1312_s6 + $0x1c0] sm:$0xff]  ;;  %v478_v49 = vmul.f32 %v1319_v1, %v220_v46  ;;  %v479_v50 = vmul.f32 %v1319_v1, %v221_v47  ;;  %v223_v52 = vld [vmem:[%s1312_s6 + $0x1c8] sm:$0xff] }
  0x50   : > { %712 = vst [vmem:[%s1335_s21 + $0x100] sm:$0xff] %v456_v3  ;;  %713 = vst [vmem:[%s1335_s21 + $0x108] sm:$0xff] %v457_v7  ;;  %v480_v51 = vmul.f32 %v1319_v1, %v222_v48  ;;  %v224_v53 = vld [vmem:[%s1312_s6 + $0x1d0] sm:$0xff]  ;;  %v225_v54 = vld [vmem:[%s1312_s6 + $0x1d8] sm:$0xff]  ;;  %v481_v55 = vmul.f32 %v1319_v1, %v223_v52 }
  0x51   : > { %714 = vst [vmem:[%s1335_s21 + $0x110] sm:$0xff] %v458_v8  ;;  %715 = vst [vmem:[%s1335_s21 + $0x118] sm:$0xff] %v459_v9  ;;  %v482_v56 = vmul.f32 %v1319_v1, %v224_v53  ;;  %v483_v57 = vmul.f32 %v1319_v1, %v225_v54  ;;  %v226_v58 = vld [vmem:[%s1312_s6 + $0x1e0] sm:$0xff]  ;;  %v227_v59 = vld [vmem:[%s1312_s6 + $0x1e8] sm:$0xff] }
  0x52   : > { %716 = vst [vmem:[%s1335_s21 + $0x120] sm:$0xff] %v460_v13  ;;  %717 = vst [vmem:[%s1335_s21 + $0x128] sm:$0xff] %v461_v14  ;;  %v228_v60 = vld [vmem:[%s1312_s6 + $0x1f0] sm:$0xff]  ;;  %v484_v61 = vmul.f32 %v1319_v1, %v226_v58  ;;  %v485_v62 = vmul.f32 %v1319_v1, %v227_v59  ;;  %v229_v0 = vld [vmem:[%s1312_s6 + $0x1f8] sm:$0xff] }
  0x53   : > { %718 = vst [vmem:[%s1335_s21 + $0x130] sm:$0xff] %v462_v15  ;;  %719 = vst [vmem:[%s1335_s21 + $0x138] sm:$0xff] %v463_v19  ;;  %v486_v63 = vmul.f32 %v1319_v1, %v228_v60  ;;  %v230_v2 = vld [vmem:[%s1312_s6 + $0x200] sm:$0xff]  ;;  %v231_v3 = vld [vmem:[%s1312_s6 + $0x208] sm:$0xff]  ;;  %v487_v4 = vmul.f32 %v1319_v1, %v229_v0 }
  0x54   : > { %720 = vst [vmem:[%s1335_s21 + $0x140] sm:$0xff] %v464_v20  ;;  %721 = vst [vmem:[%s1335_s21 + $0x148] sm:$0xff] %v465_v21  ;;  %v488_v5 = vmul.f32 %v1319_v1, %v230_v2  ;;  %v489_v6 = vmul.f32 %v1319_v1, %v231_v3  ;;  %v232_v7 = vld [vmem:[%s1312_s6 + $0x210] sm:$0xff]  ;;  %v233_v8 = vld [vmem:[%s1312_s6 + $0x218] sm:$0xff] }
  0x55   : > { %722 = vst [vmem:[%s1335_s21 + $0x150] sm:$0xff] %v466_v25  ;;  %723 = vst [vmem:[%s1335_s21 + $0x158] sm:$0xff] %v467_v26  ;;  %v234_v9 = vld [vmem:[%s1312_s6 + $0x220] sm:$0xff]  ;;  %v490_v10 = vmul.f32 %v1319_v1, %v232_v7  ;;  %v491_v11 = vmul.f32 %v1319_v1, %v233_v8  ;;  %v235_v13 = vld [vmem:[%s1312_s6 + $0x228] sm:$0xff] }
  0x56   : > { %724 = vst [vmem:[%s1335_s21 + $0x160] sm:$0xff] %v468_v27  ;;  %725 = vst [vmem:[%s1335_s21 + $0x168] sm:$0xff] %v469_v31  ;;  %v492_v12 = vmul.f32 %v1319_v1, %v234_v9  ;;  %v236_v14 = vld [vmem:[%s1312_s6 + $0x230] sm:$0xff]  ;;  %v237_v15 = vld [vmem:[%s1312_s6 + $0x238] sm:$0xff]  ;;  %v493_v16 = vmul.f32 %v1319_v1, %v235_v13 }
  0x57   : > { %726 = vst [vmem:[%s1335_s21 + $0x170] sm:$0xff] %v470_v32  ;;  %727 = vst [vmem:[%s1335_s21 + $0x178] sm:$0xff] %v471_v33  ;;  %v494_v17 = vmul.f32 %v1319_v1, %v236_v14  ;;  %v495_v18 = vmul.f32 %v1319_v1, %v237_v15  ;;  %v238_v19 = vld [vmem:[%s1312_s6 + $0x240] sm:$0xff]  ;;  %v239_v20 = vld [vmem:[%s1312_s6 + $0x248] sm:$0xff] }
  0x58   : > { %728 = vst [vmem:[%s1335_s21 + $0x180] sm:$0xff] %v472_v37  ;;  %729 = vst [vmem:[%s1335_s21 + $0x188] sm:$0xff] %v473_v38  ;;  %v240_v21 = vld [vmem:[%s1312_s6 + $0x250] sm:$0xff]  ;;  %v496_v22 = vmul.f32 %v1319_v1, %v238_v19  ;;  %v497_v23 = vmul.f32 %v1319_v1, %v239_v20  ;;  %v241_v25 = vld [vmem:[%s1312_s6 + $0x258] sm:$0xff] }
  0x59   : > { %730 = vst [vmem:[%s1335_s21 + $0x190] sm:$0xff] %v474_v39  ;;  %731 = vst [vmem:[%s1335_s21 + $0x198] sm:$0xff] %v475_v43  ;;  %v498_v24 = vmul.f32 %v1319_v1, %v240_v21  ;;  %v242_v26 = vld [vmem:[%s1312_s6 + $0x260] sm:$0xff]  ;;  %v243_v27 = vld [vmem:[%s1312_s6 + $0x268] sm:$0xff]  ;;  %v499_v28 = vmul.f32 %v1319_v1, %v241_v25 }
  0x5a   : > { %732 = vst [vmem:[%s1335_s21 + $0x1a0] sm:$0xff] %v476_v44  ;;  %733 = vst [vmem:[%s1335_s21 + $0x1a8] sm:$0xff] %v477_v45  ;;  %v500_v29 = vmul.f32 %v1319_v1, %v242_v26  ;;  %v501_v30 = vmul.f32 %v1319_v1, %v243_v27  ;;  %v244_v31 = vld [vmem:[%s1312_s6 + $0x270] sm:$0xff]  ;;  %v245_v32 = vld [vmem:[%s1312_s6 + $0x278] sm:$0xff] }
  0x5b   : > { %734 = vst [vmem:[%s1335_s21 + $0x1b0] sm:$0xff] %v478_v49  ;;  %735 = vst [vmem:[%s1335_s21 + $0x1b8] sm:$0xff] %v479_v50  ;;  %v246_v33 = vld [vmem:[%s1312_s6 + $0x280] sm:$0xff]  ;;  %v502_v34 = vmul.f32 %v1319_v1, %v244_v31  ;;  %v503_v35 = vmul.f32 %v1319_v1, %v245_v32  ;;  %v247_v37 = vld [vmem:[%s1312_s6 + $0x288] sm:$0xff] }
  0x5c   : > { %736 = vst [vmem:[%s1335_s21 + $0x1c0] sm:$0xff] %v480_v51  ;;  %737 = vst [vmem:[%s1335_s21 + $0x1c8] sm:$0xff] %v481_v55  ;;  %v504_v36 = vmul.f32 %v1319_v1, %v246_v33  ;;  %v248_v38 = vld [vmem:[%s1312_s6 + $0x290] sm:$0xff]  ;;  %v249_v39 = vld [vmem:[%s1312_s6 + $0x298] sm:$0xff]  ;;  %v505_v40 = vmul.f32 %v1319_v1, %v247_v37 }
  0x5d   : > { %738 = vst [vmem:[%s1335_s21 + $0x1d0] sm:$0xff] %v482_v56  ;;  %739 = vst [vmem:[%s1335_s21 + $0x1d8] sm:$0xff] %v483_v57  ;;  %v506_v41 = vmul.f32 %v1319_v1, %v248_v38  ;;  %v507_v42 = vmul.f32 %v1319_v1, %v249_v39  ;;  %v250_v43 = vld [vmem:[%s1312_s6 + $0x2a0] sm:$0xff]  ;;  %v251_v44 = vld [vmem:[%s1312_s6 + $0x2a8] sm:$0xff] }
  0x5e   : > { %740 = vst [vmem:[%s1335_s21 + $0x1e0] sm:$0xff] %v484_v61  ;;  %741 = vst [vmem:[%s1335_s21 + $0x1e8] sm:$0xff] %v485_v62  ;;  %v252_v45 = vld [vmem:[%s1312_s6 + $0x2b0] sm:$0xff]  ;;  %v508_v46 = vmul.f32 %v1319_v1, %v250_v43  ;;  %v509_v47 = vmul.f32 %v1319_v1, %v251_v44  ;;  %v253_v49 = vld [vmem:[%s1312_s6 + $0x2b8] sm:$0xff] }
  0x5f   : > { %742 = vst [vmem:[%s1335_s21 + $0x1f0] sm:$0xff] %v486_v63  ;;  %743 = vst [vmem:[%s1335_s21 + $0x1f8] sm:$0xff] %v487_v4  ;;  %v510_v48 = vmul.f32 %v1319_v1, %v252_v45  ;;  %v254_v50 = vld [vmem:[%s1312_s6 + $0x2c0] sm:$0xff]  ;;  %v255_v51 = vld [vmem:[%s1312_s6 + $0x2c8] sm:$0xff]  ;;  %v511_v52 = vmul.f32 %v1319_v1, %v253_v49 }
  0x60   : > { %744 = vst [vmem:[%s1335_s21 + $0x200] sm:$0xff] %v488_v5  ;;  %745 = vst [vmem:[%s1335_s21 + $0x208] sm:$0xff] %v489_v6  ;;  %v512_v53 = vmul.f32 %v1319_v1, %v254_v50  ;;  %v513_v54 = vmul.f32 %v1319_v1, %v255_v51  ;;  %v256_v55 = vld [vmem:[%s1312_s6 + $0x2d0] sm:$0xff]  ;;  %v257_v56 = vld [vmem:[%s1312_s6 + $0x2d8] sm:$0xff] }
  0x61   : > { %746 = vst [vmem:[%s1335_s21 + $0x210] sm:$0xff] %v490_v10  ;;  %747 = vst [vmem:[%s1335_s21 + $0x218] sm:$0xff] %v491_v11  ;;  %v258_v57 = vld [vmem:[%s1312_s6 + $0x2e0] sm:$0xff]  ;;  %v514_v58 = vmul.f32 %v1319_v1, %v256_v55  ;;  %v515_v59 = vmul.f32 %v1319_v1, %v257_v56  ;;  %v259_v61 = vld [vmem:[%s1312_s6 + $0x2e8] sm:$0xff] }
  0x62   : > { %748 = vst [vmem:[%s1335_s21 + $0x220] sm:$0xff] %v492_v12  ;;  %749 = vst [vmem:[%s1335_s21 + $0x228] sm:$0xff] %v493_v16  ;;  %v516_v60 = vmul.f32 %v1319_v1, %v258_v57  ;;  %v260_v62 = vld [vmem:[%s1312_s6 + $0x2f0] sm:$0xff]  ;;  %v261_v63 = vld [vmem:[%s1312_s6 + $0x2f8] sm:$0xff]  ;;  %v517_v0 = vmul.f32 %v1319_v1, %v259_v61 }
  0x63   : > { %750 = vst [vmem:[%s1335_s21 + $0x230] sm:$0xff] %v494_v17  ;;  %751 = vst [vmem:[%s1335_s21 + $0x238] sm:$0xff] %v495_v18  ;;  %v518_v2 = vmul.f32 %v1319_v1, %v260_v62  ;;  %v519_v3 = vmul.f32 %v1319_v1, %v261_v63  ;;  %v262_v4 = vld [vmem:[%s1312_s6 + $0x300] sm:$0xff]  ;;  %v263_v5 = vld [vmem:[%s1312_s6 + $0x308] sm:$0xff] }
  0x64   : > { %752 = vst [vmem:[%s1335_s21 + $0x240] sm:$0xff] %v496_v22  ;;  %753 = vst [vmem:[%s1335_s21 + $0x248] sm:$0xff] %v497_v23  ;;  %v264_v6 = vld [vmem:[%s1312_s6 + $0x310] sm:$0xff]  ;;  %v520_v7 = vmul.f32 %v1319_v1, %v262_v4  ;;  %v521_v8 = vmul.f32 %v1319_v1, %v263_v5  ;;  %v265_v10 = vld [vmem:[%s1312_s6 + $0x318] sm:$0xff] }
  0x65   : > { %754 = vst [vmem:[%s1335_s21 + $0x250] sm:$0xff] %v498_v24  ;;  %755 = vst [vmem:[%s1335_s21 + $0x258] sm:$0xff] %v499_v28  ;;  %v522_v9 = vmul.f32 %v1319_v1, %v264_v6  ;;  %v266_v11 = vld [vmem:[%s1312_s6 + $0x320] sm:$0xff]  ;;  %v267_v12 = vld [vmem:[%s1312_s6 + $0x328] sm:$0xff]  ;;  %v523_v13 = vmul.f32 %v1319_v1, %v265_v10 }
  0x66   : > { %756 = vst [vmem:[%s1335_s21 + $0x260] sm:$0xff] %v500_v29  ;;  %757 = vst [vmem:[%s1335_s21 + $0x268] sm:$0xff] %v501_v30  ;;  %v524_v14 = vmul.f32 %v1319_v1, %v266_v11  ;;  %v525_v15 = vmul.f32 %v1319_v1, %v267_v12  ;;  %v268_v16 = vld [vmem:[%s1312_s6 + $0x330] sm:$0xff]  ;;  %v269_v17 = vld [vmem:[%s1312_s6 + $0x338] sm:$0xff] }
  0x67   : > { %758 = vst [vmem:[%s1335_s21 + $0x270] sm:$0xff] %v502_v34  ;;  %759 = vst [vmem:[%s1335_s21 + $0x278] sm:$0xff] %v503_v35  ;;  %v270_v18 = vld [vmem:[%s1312_s6 + $0x340] sm:$0xff]  ;;  %v526_v19 = vmul.f32 %v1319_v1, %v268_v16  ;;  %v527_v20 = vmul.f32 %v1319_v1, %v269_v17  ;;  %v271_v22 = vld [vmem:[%s1312_s6 + $0x348] sm:$0xff] }
  0x68   : > { %760 = vst [vmem:[%s1335_s21 + $0x280] sm:$0xff] %v504_v36  ;;  %761 = vst [vmem:[%s1335_s21 + $0x288] sm:$0xff] %v505_v40  ;;  %v528_v21 = vmul.f32 %v1319_v1, %v270_v18  ;;  %v272_v23 = vld [vmem:[%s1312_s6 + $0x350] sm:$0xff]  ;;  %v273_v24 = vld [vmem:[%s1312_s6 + $0x358] sm:$0xff]  ;;  %v529_v25 = vmul.f32 %v1319_v1, %v271_v22 }
  0x69   : > { %762 = vst [vmem:[%s1335_s21 + $0x290] sm:$0xff] %v506_v41  ;;  %763 = vst [vmem:[%s1335_s21 + $0x298] sm:$0xff] %v507_v42  ;;  %v530_v26 = vmul.f32 %v1319_v1, %v272_v23  ;;  %v531_v27 = vmul.f32 %v1319_v1, %v273_v24  ;;  %v274_v28 = vld [vmem:[%s1312_s6 + $0x360] sm:$0xff]  ;;  %v275_v29 = vld [vmem:[%s1312_s6 + $0x368] sm:$0xff] }
  0x6a   : > { %764 = vst [vmem:[%s1335_s21 + $0x2a0] sm:$0xff] %v508_v46  ;;  %765 = vst [vmem:[%s1335_s21 + $0x2a8] sm:$0xff] %v509_v47  ;;  %v276_v30 = vld [vmem:[%s1312_s6 + $0x370] sm:$0xff]  ;;  %v532_v31 = vmul.f32 %v1319_v1, %v274_v28  ;;  %v533_v32 = vmul.f32 %v1319_v1, %v275_v29  ;;  %v277_v34 = vld [vmem:[%s1312_s6 + $0x378] sm:$0xff] }
  0x6b   : > { %766 = vst [vmem:[%s1335_s21 + $0x2b0] sm:$0xff] %v510_v48  ;;  %767 = vst [vmem:[%s1335_s21 + $0x2b8] sm:$0xff] %v511_v52  ;;  %v534_v33 = vmul.f32 %v1319_v1, %v276_v30  ;;  %v278_v35 = vld [vmem:[%s1312_s6 + $0x380] sm:$0xff]  ;;  %v279_v36 = vld [vmem:[%s1312_s6 + $0x388] sm:$0xff]  ;;  %v535_v37 = vmul.f32 %v1319_v1, %v277_v34 }
  0x6c   : > { %768 = vst [vmem:[%s1335_s21 + $0x2c0] sm:$0xff] %v512_v53  ;;  %769 = vst [vmem:[%s1335_s21 + $0x2c8] sm:$0xff] %v513_v54  ;;  %v536_v38 = vmul.f32 %v1319_v1, %v278_v35  ;;  %v537_v39 = vmul.f32 %v1319_v1, %v279_v36  ;;  %v280_v40 = vld [vmem:[%s1312_s6 + $0x390] sm:$0xff]  ;;  %v281_v41 = vld [vmem:[%s1312_s6 + $0x398] sm:$0xff] }
  0x6d   : > { %770 = vst [vmem:[%s1335_s21 + $0x2d0] sm:$0xff] %v514_v58  ;;  %771 = vst [vmem:[%s1335_s21 + $0x2d8] sm:$0xff] %v515_v59  ;;  %v282_v42 = vld [vmem:[%s1312_s6 + $0x3a0] sm:$0xff]  ;;  %v538_v43 = vmul.f32 %v1319_v1, %v280_v40  ;;  %v539_v44 = vmul.f32 %v1319_v1, %v281_v41  ;;  %v283_v46 = vld [vmem:[%s1312_s6 + $0x3a8] sm:$0xff] }
  0x6e   : > { %772 = vst [vmem:[%s1335_s21 + $0x2e0] sm:$0xff] %v516_v60  ;;  %773 = vst [vmem:[%s1335_s21 + $0x2e8] sm:$0xff] %v517_v0  ;;  %v540_v45 = vmul.f32 %v1319_v1, %v282_v42  ;;  %v284_v47 = vld [vmem:[%s1312_s6 + $0x3b0] sm:$0xff]  ;;  %v285_v48 = vld [vmem:[%s1312_s6 + $0x3b8] sm:$0xff]  ;;  %v541_v49 = vmul.f32 %v1319_v1, %v283_v46 }
  0x6f   : > { %774 = vst [vmem:[%s1335_s21 + $0x2f0] sm:$0xff] %v518_v2  ;;  %775 = vst [vmem:[%s1335_s21 + $0x2f8] sm:$0xff] %v519_v3  ;;  %v542_v50 = vmul.f32 %v1319_v1, %v284_v47  ;;  %v543_v51 = vmul.f32 %v1319_v1, %v285_v48  ;;  %v286_v52 = vld [vmem:[%s1312_s6 + $0x3c0] sm:$0xff]  ;;  %v287_v53 = vld [vmem:[%s1312_s6 + $0x3c8] sm:$0xff] }
  0x70   : > { %776 = vst [vmem:[%s1335_s21 + $0x300] sm:$0xff] %v520_v7  ;;  %777 = vst [vmem:[%s1335_s21 + $0x308] sm:$0xff] %v521_v8  ;;  %v288_v54 = vld [vmem:[%s1312_s6 + $0x3d0] sm:$0xff]  ;;  %v544_v55 = vmul.f32 %v1319_v1, %v286_v52  ;;  %v545_v56 = vmul.f32 %v1319_v1, %v287_v53  ;;  %v289_v58 = vld [vmem:[%s1312_s6 + $0x3d8] sm:$0xff] }
  0x71   : > { %778 = vst [vmem:[%s1335_s21 + $0x310] sm:$0xff] %v522_v9  ;;  %779 = vst [vmem:[%s1335_s21 + $0x318] sm:$0xff] %v523_v13  ;;  %v546_v57 = vmul.f32 %v1319_v1, %v288_v54  ;;  %v290_v59 = vld [vmem:[%s1312_s6 + $0x3e0] sm:$0xff]  ;;  %v291_v60 = vld [vmem:[%s1312_s6 + $0x3e8] sm:$0xff]  ;;  %v547_v61 = vmul.f32 %v1319_v1, %v289_v58 }
  0x72   : > { %780 = vst [vmem:[%s1335_s21 + $0x320] sm:$0xff] %v524_v14  ;;  %781 = vst [vmem:[%s1335_s21 + $0x328] sm:$0xff] %v525_v15  ;;  %v548_v62 = vmul.f32 %v1319_v1, %v290_v59  ;;  %v549_v63 = vmul.f32 %v1319_v1, %v291_v60  ;;  %v292_v0 = vld [vmem:[%s1312_s6 + $0x3f0] sm:$0xff]  ;;  %v293_v2 = vld [vmem:[%s1312_s6 + $0x3f8] sm:$0xff] }
  0x73   : > { %782 = vst [vmem:[%s1335_s21 + $0x330] sm:$0xff] %v526_v19  ;;  %783 = vst [vmem:[%s1335_s21 + $0x338] sm:$0xff] %v527_v20  ;;  %v294_v3 = vld [vmem:[%s1312_s6 + $0x400] sm:$0xff]  ;;  %v550_v4 = vmul.f32 %v1319_v1, %v292_v0  ;;  %v551_v5 = vmul.f32 %v1319_v1, %v293_v2  ;;  %v295_v7 = vld [vmem:[%s1312_s6 + $0x408] sm:$0xff] }
  0x74   : > { %784 = vst [vmem:[%s1335_s21 + $0x340] sm:$0xff] %v528_v21  ;;  %785 = vst [vmem:[%s1335_s21 + $0x348] sm:$0xff] %v529_v25  ;;  %v552_v6 = vmul.f32 %v1319_v1, %v294_v3  ;;  %v296_v8 = vld [vmem:[%s1312_s6 + $0x410] sm:$0xff]  ;;  %v297_v9 = vld [vmem:[%s1312_s6 + $0x418] sm:$0xff]  ;;  %v553_v10 = vmul.f32 %v1319_v1, %v295_v7 }
  0x75   : > { %786 = vst [vmem:[%s1335_s21 + $0x350] sm:$0xff] %v530_v26  ;;  %787 = vst [vmem:[%s1335_s21 + $0x358] sm:$0xff] %v531_v27  ;;  %v554_v11 = vmul.f32 %v1319_v1, %v296_v8  ;;  %v555_v12 = vmul.f32 %v1319_v1, %v297_v9  ;;  %v298_v13 = vld [vmem:[%s1312_s6 + $0x420] sm:$0xff]  ;;  %v299_v14 = vld [vmem:[%s1312_s6 + $0x428] sm:$0xff] }
  0x76   : > { %788 = vst [vmem:[%s1335_s21 + $0x360] sm:$0xff] %v532_v31  ;;  %789 = vst [vmem:[%s1335_s21 + $0x368] sm:$0xff] %v533_v32  ;;  %v300_v15 = vld [vmem:[%s1312_s6 + $0x430] sm:$0xff]  ;;  %v556_v16 = vmul.f32 %v1319_v1, %v298_v13  ;;  %v557_v17 = vmul.f32 %v1319_v1, %v299_v14  ;;  %v301_v19 = vld [vmem:[%s1312_s6 + $0x438] sm:$0xff] }
  0x77   : > { %790 = vst [vmem:[%s1335_s21 + $0x370] sm:$0xff] %v534_v33  ;;  %791 = vst [vmem:[%s1335_s21 + $0x378] sm:$0xff] %v535_v37  ;;  %v558_v18 = vmul.f32 %v1319_v1, %v300_v15  ;;  %v302_v20 = vld [vmem:[%s1312_s6 + $0x440] sm:$0xff]  ;;  %v303_v21 = vld [vmem:[%s1312_s6 + $0x448] sm:$0xff]  ;;  %v559_v22 = vmul.f32 %v1319_v1, %v301_v19 }
  0x78   : > { %792 = vst [vmem:[%s1335_s21 + $0x380] sm:$0xff] %v536_v38  ;;  %793 = vst [vmem:[%s1335_s21 + $0x388] sm:$0xff] %v537_v39  ;;  %v560_v23 = vmul.f32 %v1319_v1, %v302_v20  ;;  %v561_v24 = vmul.f32 %v1319_v1, %v303_v21  ;;  %v304_v25 = vld [vmem:[%s1312_s6 + $0x450] sm:$0xff]  ;;  %v305_v26 = vld [vmem:[%s1312_s6 + $0x458] sm:$0xff] }
  0x79   : > { %794 = vst [vmem:[%s1335_s21 + $0x390] sm:$0xff] %v538_v43  ;;  %795 = vst [vmem:[%s1335_s21 + $0x398] sm:$0xff] %v539_v44  ;;  %v306_v27 = vld [vmem:[%s1312_s6 + $0x460] sm:$0xff]  ;;  %v562_v28 = vmul.f32 %v1319_v1, %v304_v25  ;;  %v563_v29 = vmul.f32 %v1319_v1, %v305_v26  ;;  %v307_v31 = vld [vmem:[%s1312_s6 + $0x468] sm:$0xff] }
  0x7a   : > { %796 = vst [vmem:[%s1335_s21 + $0x3a0] sm:$0xff] %v540_v45  ;;  %797 = vst [vmem:[%s1335_s21 + $0x3a8] sm:$0xff] %v541_v49  ;;  %v564_v30 = vmul.f32 %v1319_v1, %v306_v27  ;;  %v308_v32 = vld [vmem:[%s1312_s6 + $0x470] sm:$0xff]  ;;  %v309_v33 = vld [vmem:[%s1312_s6 + $0x478] sm:$0xff]  ;;  %v565_v34 = vmul.f32 %v1319_v1, %v307_v31 }
  0x7b   : > { %798 = vst [vmem:[%s1335_s21 + $0x3b0] sm:$0xff] %v542_v50  ;;  %799 = vst [vmem:[%s1335_s21 + $0x3b8] sm:$0xff] %v543_v51  ;;  %v566_v35 = vmul.f32 %v1319_v1, %v308_v32  ;;  %v567_v36 = vmul.f32 %v1319_v1, %v309_v33  ;;  %v310_v37 = vld [vmem:[%s1312_s6 + $0x480] sm:$0xff]  ;;  %v311_v38 = vld [vmem:[%s1312_s6 + $0x488] sm:$0xff] }
  0x7c   : > { %800 = vst [vmem:[%s1335_s21 + $0x3c0] sm:$0xff] %v544_v55  ;;  %801 = vst [vmem:[%s1335_s21 + $0x3c8] sm:$0xff] %v545_v56  ;;  %v312_v39 = vld [vmem:[%s1312_s6 + $0x490] sm:$0xff]  ;;  %v568_v40 = vmul.f32 %v1319_v1, %v310_v37  ;;  %v569_v41 = vmul.f32 %v1319_v1, %v311_v38  ;;  %v313_v43 = vld [vmem:[%s1312_s6 + $0x498] sm:$0xff] }
  0x7d   : > { %802 = vst [vmem:[%s1335_s21 + $0x3d0] sm:$0xff] %v546_v57  ;;  %803 = vst [vmem:[%s1335_s21 + $0x3d8] sm:$0xff] %v547_v61  ;;  %v570_v42 = vmul.f32 %v1319_v1, %v312_v39  ;;  %v314_v44 = vld [vmem:[%s1312_s6 + $0x4a0] sm:$0xff]  ;;  %v315_v45 = vld [vmem:[%s1312_s6 + $0x4a8] sm:$0xff]  ;;  %v571_v46 = vmul.f32 %v1319_v1, %v313_v43 }
  0x7e   : > { %804 = vst [vmem:[%s1335_s21 + $0x3e0] sm:$0xff] %v548_v62  ;;  %805 = vst [vmem:[%s1335_s21 + $0x3e8] sm:$0xff] %v549_v63  ;;  %v572_v47 = vmul.f32 %v1319_v1, %v314_v44  ;;  %v573_v48 = vmul.f32 %v1319_v1, %v315_v45  ;;  %v316_v49 = vld [vmem:[%s1312_s6 + $0x4b0] sm:$0xff]  ;;  %v317_v50 = vld [vmem:[%s1312_s6 + $0x4b8] sm:$0xff] }
  0x7f   : > { %806 = vst [vmem:[%s1335_s21 + $0x3f0] sm:$0xff] %v550_v4  ;;  %807 = vst [vmem:[%s1335_s21 + $0x3f8] sm:$0xff] %v551_v5  ;;  %v318_v51 = vld [vmem:[%s1312_s6 + $0x4c0] sm:$0xff]  ;;  %v574_v52 = vmul.f32 %v1319_v1, %v316_v49  ;;  %v575_v53 = vmul.f32 %v1319_v1, %v317_v50  ;;  %v319_v55 = vld [vmem:[%s1312_s6 + $0x4c8] sm:$0xff] }
  0x80   : > { %808 = vst [vmem:[%s1335_s21 + $0x400] sm:$0xff] %v552_v6  ;;  %809 = vst [vmem:[%s1335_s21 + $0x408] sm:$0xff] %v553_v10  ;;  %v576_v54 = vmul.f32 %v1319_v1, %v318_v51  ;;  %v320_v56 = vld [vmem:[%s1312_s6 + $0x4d0] sm:$0xff]  ;;  %v321_v57 = vld [vmem:[%s1312_s6 + $0x4d8] sm:$0xff]  ;;  %v577_v58 = vmul.f32 %v1319_v1, %v319_v55 }
  0x81   : > { %810 = vst [vmem:[%s1335_s21 + $0x410] sm:$0xff] %v554_v11  ;;  %811 = vst [vmem:[%s1335_s21 + $0x418] sm:$0xff] %v555_v12  ;;  %v578_v59 = vmul.f32 %v1319_v1, %v320_v56  ;;  %v579_v60 = vmul.f32 %v1319_v1, %v321_v57  ;;  %v322_v61 = vld [vmem:[%s1312_s6 + $0x4e0] sm:$0xff]  ;;  %v323_v62 = vld [vmem:[%s1312_s6 + $0x4e8] sm:$0xff] }
  0x82   : > { %812 = vst [vmem:[%s1335_s21 + $0x420] sm:$0xff] %v556_v16  ;;  %813 = vst [vmem:[%s1335_s21 + $0x428] sm:$0xff] %v557_v17  ;;  %v324_v63 = vld [vmem:[%s1312_s6 + $0x4f0] sm:$0xff]  ;;  %v580_v0 = vmul.f32 %v1319_v1, %v322_v61  ;;  %v581_v2 = vmul.f32 %v1319_v1, %v323_v62  ;;  %v325_v4 = vld [vmem:[%s1312_s6 + $0x4f8] sm:$0xff] }
  0x83   : > { %814 = vst [vmem:[%s1335_s21 + $0x430] sm:$0xff] %v558_v18  ;;  %815 = vst [vmem:[%s1335_s21 + $0x438] sm:$0xff] %v559_v22  ;;  %v582_v3 = vmul.f32 %v1319_v1, %v324_v63  ;;  %v326_v5 = vld [vmem:[%s1312_s6 + $0x500] sm:$0xff]  ;;  %v327_v6 = vld [vmem:[%s1312_s6 + $0x508] sm:$0xff]  ;;  %v583_v7 = vmul.f32 %v1319_v1, %v325_v4 }
  0x84   : > { %816 = vst [vmem:[%s1335_s21 + $0x440] sm:$0xff] %v560_v23  ;;  %817 = vst [vmem:[%s1335_s21 + $0x448] sm:$0xff] %v561_v24  ;;  %v584_v8 = vmul.f32 %v1319_v1, %v326_v5  ;;  %v585_v9 = vmul.f32 %v1319_v1, %v327_v6  ;;  %v328_v10 = vld [vmem:[%s1312_s6 + $0x510] sm:$0xff]  ;;  %v329_v11 = vld [vmem:[%s1312_s6 + $0x518] sm:$0xff] }
  0x85   : > { %818 = vst [vmem:[%s1335_s21 + $0x450] sm:$0xff] %v562_v28  ;;  %819 = vst [vmem:[%s1335_s21 + $0x458] sm:$0xff] %v563_v29  ;;  %v330_v12 = vld [vmem:[%s1312_s6 + $0x520] sm:$0xff]  ;;  %v586_v13 = vmul.f32 %v1319_v1, %v328_v10  ;;  %v587_v14 = vmul.f32 %v1319_v1, %v329_v11  ;;  %v331_v16 = vld [vmem:[%s1312_s6 + $0x528] sm:$0xff] }
  0x86   : > { %820 = vst [vmem:[%s1335_s21 + $0x460] sm:$0xff] %v564_v30  ;;  %821 = vst [vmem:[%s1335_s21 + $0x468] sm:$0xff] %v565_v34  ;;  %v588_v15 = vmul.f32 %v1319_v1, %v330_v12  ;;  %v332_v17 = vld [vmem:[%s1312_s6 + $0x530] sm:$0xff]  ;;  %v333_v18 = vld [vmem:[%s1312_s6 + $0x538] sm:$0xff]  ;;  %v589_v19 = vmul.f32 %v1319_v1, %v331_v16 }
  0x87   : > { %822 = vst [vmem:[%s1335_s21 + $0x470] sm:$0xff] %v566_v35  ;;  %823 = vst [vmem:[%s1335_s21 + $0x478] sm:$0xff] %v567_v36  ;;  %v590_v20 = vmul.f32 %v1319_v1, %v332_v17  ;;  %v591_v21 = vmul.f32 %v1319_v1, %v333_v18  ;;  %v334_v22 = vld [vmem:[%s1312_s6 + $0x540] sm:$0xff]  ;;  %v335_v23 = vld [vmem:[%s1312_s6 + $0x548] sm:$0xff] }
  0x88   : > { %824 = vst [vmem:[%s1335_s21 + $0x480] sm:$0xff] %v568_v40  ;;  %825 = vst [vmem:[%s1335_s21 + $0x488] sm:$0xff] %v569_v41  ;;  %v336_v24 = vld [vmem:[%s1312_s6 + $0x550] sm:$0xff]  ;;  %v592_v25 = vmul.f32 %v1319_v1, %v334_v22  ;;  %v593_v26 = vmul.f32 %v1319_v1, %v335_v23  ;;  %v337_v28 = vld [vmem:[%s1312_s6 + $0x558] sm:$0xff] }
  0x89   : > { %826 = vst [vmem:[%s1335_s21 + $0x490] sm:$0xff] %v570_v42  ;;  %827 = vst [vmem:[%s1335_s21 + $0x498] sm:$0xff] %v571_v46  ;;  %v594_v27 = vmul.f32 %v1319_v1, %v336_v24  ;;  %v338_v29 = vld [vmem:[%s1312_s6 + $0x560] sm:$0xff]  ;;  %v339_v30 = vld [vmem:[%s1312_s6 + $0x568] sm:$0xff]  ;;  %v595_v31 = vmul.f32 %v1319_v1, %v337_v28 }
  0x8a   : > { %828 = vst [vmem:[%s1335_s21 + $0x4a0] sm:$0xff] %v572_v47  ;;  %829 = vst [vmem:[%s1335_s21 + $0x4a8] sm:$0xff] %v573_v48  ;;  %v596_v32 = vmul.f32 %v1319_v1, %v338_v29  ;;  %v597_v33 = vmul.f32 %v1319_v1, %v339_v30  ;;  %v340_v34 = vld [vmem:[%s1312_s6 + $0x570] sm:$0xff]  ;;  %v341_v35 = vld [vmem:[%s1312_s6 + $0x578] sm:$0xff] }
  0x8b   : > { %830 = vst [vmem:[%s1335_s21 + $0x4b0] sm:$0xff] %v574_v52  ;;  %831 = vst [vmem:[%s1335_s21 + $0x4b8] sm:$0xff] %v575_v53  ;;  %v342_v36 = vld [vmem:[%s1312_s6 + $0x580] sm:$0xff]  ;;  %v598_v37 = vmul.f32 %v1319_v1, %v340_v34  ;;  %v599_v38 = vmul.f32 %v1319_v1, %v341_v35  ;;  %v343_v40 = vld [vmem:[%s1312_s6 + $0x588] sm:$0xff] }
  0x8c   : > { %832 = vst [vmem:[%s1335_s21 + $0x4c0] sm:$0xff] %v576_v54  ;;  %833 = vst [vmem:[%s1335_s21 + $0x4c8] sm:$0xff] %v577_v58  ;;  %v600_v39 = vmul.f32 %v1319_v1, %v342_v36  ;;  %v344_v41 = vld [vmem:[%s1312_s6 + $0x590] sm:$0xff]  ;;  %v345_v42 = vld [vmem:[%s1312_s6 + $0x598] sm:$0xff]  ;;  %v601_v43 = vmul.f32 %v1319_v1, %v343_v40 }
  0x8d   : > { %834 = vst [vmem:[%s1335_s21 + $0x4d0] sm:$0xff] %v578_v59  ;;  %835 = vst [vmem:[%s1335_s21 + $0x4d8] sm:$0xff] %v579_v60  ;;  %v602_v44 = vmul.f32 %v1319_v1, %v344_v41  ;;  %v603_v45 = vmul.f32 %v1319_v1, %v345_v42  ;;  %v346_v46 = vld [vmem:[%s1312_s6 + $0x5a0] sm:$0xff]  ;;  %v347_v47 = vld [vmem:[%s1312_s6 + $0x5a8] sm:$0xff] }
  0x8e   : > { %836 = vst [vmem:[%s1335_s21 + $0x4e0] sm:$0xff] %v580_v0  ;;  %837 = vst [vmem:[%s1335_s21 + $0x4e8] sm:$0xff] %v581_v2  ;;  %v348_v48 = vld [vmem:[%s1312_s6 + $0x5b0] sm:$0xff]  ;;  %v604_v49 = vmul.f32 %v1319_v1, %v346_v46  ;;  %v605_v50 = vmul.f32 %v1319_v1, %v347_v47  ;;  %v349_v52 = vld [vmem:[%s1312_s6 + $0x5b8] sm:$0xff] }
  0x8f   : > { %838 = vst [vmem:[%s1335_s21 + $0x4f0] sm:$0xff] %v582_v3  ;;  %839 = vst [vmem:[%s1335_s21 + $0x4f8] sm:$0xff] %v583_v7  ;;  %v606_v51 = vmul.f32 %v1319_v1, %v348_v48  ;;  %v350_v53 = vld [vmem:[%s1312_s6 + $0x5c0] sm:$0xff]  ;;  %v351_v54 = vld [vmem:[%s1312_s6 + $0x5c8] sm:$0xff]  ;;  %v607_v55 = vmul.f32 %v1319_v1, %v349_v52 }
  0x90   : > { %840 = vst [vmem:[%s1335_s21 + $0x500] sm:$0xff] %v584_v8  ;;  %841 = vst [vmem:[%s1335_s21 + $0x508] sm:$0xff] %v585_v9  ;;  %v608_v56 = vmul.f32 %v1319_v1, %v350_v53  ;;  %v609_v57 = vmul.f32 %v1319_v1, %v351_v54  ;;  %v352_v58 = vld [vmem:[%s1312_s6 + $0x5d0] sm:$0xff]  ;;  %v353_v59 = vld [vmem:[%s1312_s6 + $0x5d8] sm:$0xff] }
  0x91   : > { %842 = vst [vmem:[%s1335_s21 + $0x510] sm:$0xff] %v586_v13  ;;  %843 = vst [vmem:[%s1335_s21 + $0x518] sm:$0xff] %v587_v14  ;;  %v354_v60 = vld [vmem:[%s1312_s6 + $0x5e0] sm:$0xff]  ;;  %v610_v61 = vmul.f32 %v1319_v1, %v352_v58  ;;  %v611_v62 = vmul.f32 %v1319_v1, %v353_v59  ;;  %v355_v0 = vld [vmem:[%s1312_s6 + $0x5e8] sm:$0xff] }
  0x92   : > { %844 = vst [vmem:[%s1335_s21 + $0x520] sm:$0xff] %v588_v15  ;;  %845 = vst [vmem:[%s1335_s21 + $0x528] sm:$0xff] %v589_v19  ;;  %v612_v63 = vmul.f32 %v1319_v1, %v354_v60  ;;  %v356_v2 = vld [vmem:[%s1312_s6 + $0x5f0] sm:$0xff]  ;;  %v357_v3 = vld [vmem:[%s1312_s6 + $0x5f8] sm:$0xff]  ;;  %v613_v4 = vmul.f32 %v1319_v1, %v355_v0 }
  0x93   : > { %846 = vst [vmem:[%s1335_s21 + $0x530] sm:$0xff] %v590_v20  ;;  %847 = vst [vmem:[%s1335_s21 + $0x538] sm:$0xff] %v591_v21  ;;  %v614_v5 = vmul.f32 %v1319_v1, %v356_v2  ;;  %v615_v6 = vmul.f32 %v1319_v1, %v357_v3  ;;  %v358_v7 = vld [vmem:[%s1312_s6 + $0x600] sm:$0xff]  ;;  %v359_v8 = vld [vmem:[%s1312_s6 + $0x608] sm:$0xff] }
  0x94   : > { %848 = vst [vmem:[%s1335_s21 + $0x540] sm:$0xff] %v592_v25  ;;  %849 = vst [vmem:[%s1335_s21 + $0x548] sm:$0xff] %v593_v26  ;;  %v360_v9 = vld [vmem:[%s1312_s6 + $0x610] sm:$0xff]  ;;  %v616_v10 = vmul.f32 %v1319_v1, %v358_v7  ;;  %v617_v11 = vmul.f32 %v1319_v1, %v359_v8  ;;  %v361_v13 = vld [vmem:[%s1312_s6 + $0x618] sm:$0xff] }
  0x95   : > { %850 = vst [vmem:[%s1335_s21 + $0x550] sm:$0xff] %v594_v27  ;;  %851 = vst [vmem:[%s1335_s21 + $0x558] sm:$0xff] %v595_v31  ;;  %v618_v12 = vmul.f32 %v1319_v1, %v360_v9  ;;  %v362_v14 = vld [vmem:[%s1312_s6 + $0x620] sm:$0xff]  ;;  %v363_v15 = vld [vmem:[%s1312_s6 + $0x628] sm:$0xff]  ;;  %v619_v16 = vmul.f32 %v1319_v1, %v361_v13 }
  0x96   : > { %852 = vst [vmem:[%s1335_s21 + $0x560] sm:$0xff] %v596_v32  ;;  %853 = vst [vmem:[%s1335_s21 + $0x568] sm:$0xff] %v597_v33  ;;  %v620_v17 = vmul.f32 %v1319_v1, %v362_v14  ;;  %v621_v18 = vmul.f32 %v1319_v1, %v363_v15  ;;  %v364_v19 = vld [vmem:[%s1312_s6 + $0x630] sm:$0xff]  ;;  %v365_v20 = vld [vmem:[%s1312_s6 + $0x638] sm:$0xff] }
  0x97   : > { %854 = vst [vmem:[%s1335_s21 + $0x570] sm:$0xff] %v598_v37  ;;  %855 = vst [vmem:[%s1335_s21 + $0x578] sm:$0xff] %v599_v38  ;;  %v366_v21 = vld [vmem:[%s1312_s6 + $0x640] sm:$0xff]  ;;  %v622_v22 = vmul.f32 %v1319_v1, %v364_v19  ;;  %v623_v23 = vmul.f32 %v1319_v1, %v365_v20  ;;  %v367_v25 = vld [vmem:[%s1312_s6 + $0x648] sm:$0xff] }
  0x98   : > { %856 = vst [vmem:[%s1335_s21 + $0x580] sm:$0xff] %v600_v39  ;;  %857 = vst [vmem:[%s1335_s21 + $0x588] sm:$0xff] %v601_v43  ;;  %v624_v24 = vmul.f32 %v1319_v1, %v366_v21  ;;  %v368_v26 = vld [vmem:[%s1312_s6 + $0x650] sm:$0xff]  ;;  %v369_v27 = vld [vmem:[%s1312_s6 + $0x658] sm:$0xff]  ;;  %v625_v28 = vmul.f32 %v1319_v1, %v367_v25 }
  0x99   : > { %858 = vst [vmem:[%s1335_s21 + $0x590] sm:$0xff] %v602_v44  ;;  %859 = vst [vmem:[%s1335_s21 + $0x598] sm:$0xff] %v603_v45  ;;  %v626_v29 = vmul.f32 %v1319_v1, %v368_v26  ;;  %v627_v30 = vmul.f32 %v1319_v1, %v369_v27  ;;  %v370_v31 = vld [vmem:[%s1312_s6 + $0x660] sm:$0xff]  ;;  %v371_v32 = vld [vmem:[%s1312_s6 + $0x668] sm:$0xff] }
  0x9a   : > { %860 = vst [vmem:[%s1335_s21 + $0x5a0] sm:$0xff] %v604_v49  ;;  %861 = vst [vmem:[%s1335_s21 + $0x5a8] sm:$0xff] %v605_v50  ;;  %v372_v33 = vld [vmem:[%s1312_s6 + $0x670] sm:$0xff]  ;;  %v628_v34 = vmul.f32 %v1319_v1, %v370_v31  ;;  %v629_v35 = vmul.f32 %v1319_v1, %v371_v32  ;;  %v373_v37 = vld [vmem:[%s1312_s6 + $0x678] sm:$0xff] }
  0x9b   : > { %862 = vst [vmem:[%s1335_s21 + $0x5b0] sm:$0xff] %v606_v51  ;;  %863 = vst [vmem:[%s1335_s21 + $0x5b8] sm:$0xff] %v607_v55  ;;  %v630_v36 = vmul.f32 %v1319_v1, %v372_v33  ;;  %v374_v38 = vld [vmem:[%s1312_s6 + $0x680] sm:$0xff]  ;;  %v375_v39 = vld [vmem:[%s1312_s6 + $0x688] sm:$0xff]  ;;  %v631_v40 = vmul.f32 %v1319_v1, %v373_v37 }
  0x9c   : > { %864 = vst [vmem:[%s1335_s21 + $0x5c0] sm:$0xff] %v608_v56  ;;  %865 = vst [vmem:[%s1335_s21 + $0x5c8] sm:$0xff] %v609_v57  ;;  %v632_v41 = vmul.f32 %v1319_v1, %v374_v38  ;;  %v633_v42 = vmul.f32 %v1319_v1, %v375_v39  ;;  %v376_v43 = vld [vmem:[%s1312_s6 + $0x690] sm:$0xff]  ;;  %v377_v44 = vld [vmem:[%s1312_s6 + $0x698] sm:$0xff] }
  0x9d   : > { %866 = vst [vmem:[%s1335_s21 + $0x5d0] sm:$0xff] %v610_v61  ;;  %867 = vst [vmem:[%s1335_s21 + $0x5d8] sm:$0xff] %v611_v62  ;;  %v378_v45 = vld [vmem:[%s1312_s6 + $0x6a0] sm:$0xff]  ;;  %v634_v46 = vmul.f32 %v1319_v1, %v376_v43  ;;  %v635_v47 = vmul.f32 %v1319_v1, %v377_v44  ;;  %v379_v49 = vld [vmem:[%s1312_s6 + $0x6a8] sm:$0xff] }
  0x9e   : > { %868 = vst [vmem:[%s1335_s21 + $0x5e0] sm:$0xff] %v612_v63  ;;  %869 = vst [vmem:[%s1335_s21 + $0x5e8] sm:$0xff] %v613_v4  ;;  %v636_v48 = vmul.f32 %v1319_v1, %v378_v45  ;;  %v380_v50 = vld [vmem:[%s1312_s6 + $0x6b0] sm:$0xff]  ;;  %v381_v51 = vld [vmem:[%s1312_s6 + $0x6b8] sm:$0xff]  ;;  %v637_v52 = vmul.f32 %v1319_v1, %v379_v49 }
  0x9f   : > { %870 = vst [vmem:[%s1335_s21 + $0x5f0] sm:$0xff] %v614_v5  ;;  %871 = vst [vmem:[%s1335_s21 + $0x5f8] sm:$0xff] %v615_v6  ;;  %v638_v53 = vmul.f32 %v1319_v1, %v380_v50  ;;  %v639_v54 = vmul.f32 %v1319_v1, %v381_v51  ;;  %v382_v55 = vld [vmem:[%s1312_s6 + $0x6c0] sm:$0xff]  ;;  %v383_v56 = vld [vmem:[%s1312_s6 + $0x6c8] sm:$0xff] }
  0xa0   : > { %872 = vst [vmem:[%s1335_s21 + $0x600] sm:$0xff] %v616_v10  ;;  %873 = vst [vmem:[%s1335_s21 + $0x608] sm:$0xff] %v617_v11  ;;  %v384_v57 = vld [vmem:[%s1312_s6 + $0x6d0] sm:$0xff]  ;;  %v640_v58 = vmul.f32 %v1319_v1, %v382_v55  ;;  %v641_v59 = vmul.f32 %v1319_v1, %v383_v56  ;;  %v385_v61 = vld [vmem:[%s1312_s6 + $0x6d8] sm:$0xff] }
  0xa1   : > { %874 = vst [vmem:[%s1335_s21 + $0x610] sm:$0xff] %v618_v12  ;;  %875 = vst [vmem:[%s1335_s21 + $0x618] sm:$0xff] %v619_v16  ;;  %v642_v60 = vmul.f32 %v1319_v1, %v384_v57  ;;  %v386_v62 = vld [vmem:[%s1312_s6 + $0x6e0] sm:$0xff]  ;;  %v387_v63 = vld [vmem:[%s1312_s6 + $0x6e8] sm:$0xff]  ;;  %v643_v0 = vmul.f32 %v1319_v1, %v385_v61 }
  0xa2   : > { %876 = vst [vmem:[%s1335_s21 + $0x620] sm:$0xff] %v620_v17  ;;  %877 = vst [vmem:[%s1335_s21 + $0x628] sm:$0xff] %v621_v18  ;;  %v644_v2 = vmul.f32 %v1319_v1, %v386_v62  ;;  %v645_v3 = vmul.f32 %v1319_v1, %v387_v63  ;;  %v388_v4 = vld [vmem:[%s1312_s6 + $0x6f0] sm:$0xff]  ;;  %v389_v5 = vld [vmem:[%s1312_s6 + $0x6f8] sm:$0xff] }
  0xa3   : > { %878 = vst [vmem:[%s1335_s21 + $0x630] sm:$0xff] %v622_v22  ;;  %879 = vst [vmem:[%s1335_s21 + $0x638] sm:$0xff] %v623_v23  ;;  %v390_v6 = vld [vmem:[%s1312_s6 + $0x700] sm:$0xff]  ;;  %v646_v7 = vmul.f32 %v1319_v1, %v388_v4  ;;  %v647_v8 = vmul.f32 %v1319_v1, %v389_v5  ;;  %v391_v10 = vld [vmem:[%s1312_s6 + $0x708] sm:$0xff] }
  0xa4   : > { %880 = vst [vmem:[%s1335_s21 + $0x640] sm:$0xff] %v624_v24  ;;  %881 = vst [vmem:[%s1335_s21 + $0x648] sm:$0xff] %v625_v28  ;;  %v648_v9 = vmul.f32 %v1319_v1, %v390_v6  ;;  %v392_v11 = vld [vmem:[%s1312_s6 + $0x710] sm:$0xff]  ;;  %v393_v12 = vld [vmem:[%s1312_s6 + $0x718] sm:$0xff]  ;;  %v649_v13 = vmul.f32 %v1319_v1, %v391_v10 }
  0xa5   : > { %882 = vst [vmem:[%s1335_s21 + $0x650] sm:$0xff] %v626_v29  ;;  %883 = vst [vmem:[%s1335_s21 + $0x658] sm:$0xff] %v627_v30  ;;  %v650_v14 = vmul.f32 %v1319_v1, %v392_v11  ;;  %v651_v15 = vmul.f32 %v1319_v1, %v393_v12  ;;  %v394_v16 = vld [vmem:[%s1312_s6 + $0x720] sm:$0xff]  ;;  %v395_v17 = vld [vmem:[%s1312_s6 + $0x728] sm:$0xff] }
  0xa6   : > { %884 = vst [vmem:[%s1335_s21 + $0x660] sm:$0xff] %v628_v34  ;;  %885 = vst [vmem:[%s1335_s21 + $0x668] sm:$0xff] %v629_v35  ;;  %v396_v18 = vld [vmem:[%s1312_s6 + $0x730] sm:$0xff]  ;;  %v652_v19 = vmul.f32 %v1319_v1, %v394_v16  ;;  %v653_v20 = vmul.f32 %v1319_v1, %v395_v17  ;;  %v397_v22 = vld [vmem:[%s1312_s6 + $0x738] sm:$0xff] }
  0xa7   : > { %886 = vst [vmem:[%s1335_s21 + $0x670] sm:$0xff] %v630_v36  ;;  %887 = vst [vmem:[%s1335_s21 + $0x678] sm:$0xff] %v631_v40  ;;  %v654_v21 = vmul.f32 %v1319_v1, %v396_v18  ;;  %v398_v23 = vld [vmem:[%s1312_s6 + $0x740] sm:$0xff]  ;;  %v399_v24 = vld [vmem:[%s1312_s6 + $0x748] sm:$0xff]  ;;  %v655_v25 = vmul.f32 %v1319_v1, %v397_v22 }
  0xa8   : > { %888 = vst [vmem:[%s1335_s21 + $0x680] sm:$0xff] %v632_v41  ;;  %889 = vst [vmem:[%s1335_s21 + $0x688] sm:$0xff] %v633_v42  ;;  %v656_v26 = vmul.f32 %v1319_v1, %v398_v23  ;;  %v657_v27 = vmul.f32 %v1319_v1, %v399_v24  ;;  %v400_v28 = vld [vmem:[%s1312_s6 + $0x750] sm:$0xff]  ;;  %v401_v29 = vld [vmem:[%s1312_s6 + $0x758] sm:$0xff] }
  0xa9   : > { %890 = vst [vmem:[%s1335_s21 + $0x690] sm:$0xff] %v634_v46  ;;  %891 = vst [vmem:[%s1335_s21 + $0x698] sm:$0xff] %v635_v47  ;;  %v402_v30 = vld [vmem:[%s1312_s6 + $0x760] sm:$0xff]  ;;  %v658_v31 = vmul.f32 %v1319_v1, %v400_v28  ;;  %v659_v32 = vmul.f32 %v1319_v1, %v401_v29  ;;  %v403_v34 = vld [vmem:[%s1312_s6 + $0x768] sm:$0xff] }
  0xaa   : > { %892 = vst [vmem:[%s1335_s21 + $0x6a0] sm:$0xff] %v636_v48  ;;  %893 = vst [vmem:[%s1335_s21 + $0x6a8] sm:$0xff] %v637_v52  ;;  %v660_v33 = vmul.f32 %v1319_v1, %v402_v30  ;;  %v404_v35 = vld [vmem:[%s1312_s6 + $0x770] sm:$0xff]  ;;  %v405_v36 = vld [vmem:[%s1312_s6 + $0x778] sm:$0xff]  ;;  %v661_v37 = vmul.f32 %v1319_v1, %v403_v34 }
  0xab   : > { %894 = vst [vmem:[%s1335_s21 + $0x6b0] sm:$0xff] %v638_v53  ;;  %895 = vst [vmem:[%s1335_s21 + $0x6b8] sm:$0xff] %v639_v54  ;;  %v662_v38 = vmul.f32 %v1319_v1, %v404_v35  ;;  %v663_v39 = vmul.f32 %v1319_v1, %v405_v36  ;;  %v406_v40 = vld [vmem:[%s1312_s6 + $0x780] sm:$0xff]  ;;  %v407_v41 = vld [vmem:[%s1312_s6 + $0x788] sm:$0xff] }
  0xac   : > { %896 = vst [vmem:[%s1335_s21 + $0x6c0] sm:$0xff] %v640_v58  ;;  %897 = vst [vmem:[%s1335_s21 + $0x6c8] sm:$0xff] %v641_v59  ;;  %v408_v42 = vld [vmem:[%s1312_s6 + $0x790] sm:$0xff]  ;;  %v664_v43 = vmul.f32 %v1319_v1, %v406_v40  ;;  %v665_v44 = vmul.f32 %v1319_v1, %v407_v41  ;;  %v409_v46 = vld [vmem:[%s1312_s6 + $0x798] sm:$0xff] }
  0xad   : > { %898 = vst [vmem:[%s1335_s21 + $0x6d0] sm:$0xff] %v642_v60  ;;  %899 = vst [vmem:[%s1335_s21 + $0x6d8] sm:$0xff] %v643_v0  ;;  %v666_v45 = vmul.f32 %v1319_v1, %v408_v42  ;;  %v410_v47 = vld [vmem:[%s1312_s6 + $0x7a0] sm:$0xff]  ;;  %v411_v48 = vld [vmem:[%s1312_s6 + $0x7a8] sm:$0xff]  ;;  %v667_v49 = vmul.f32 %v1319_v1, %v409_v46 }
  0xae   : > { %900 = vst [vmem:[%s1335_s21 + $0x6e0] sm:$0xff] %v644_v2  ;;  %901 = vst [vmem:[%s1335_s21 + $0x6e8] sm:$0xff] %v645_v3  ;;  %v668_v50 = vmul.f32 %v1319_v1, %v410_v47  ;;  %v669_v51 = vmul.f32 %v1319_v1, %v411_v48  ;;  %v412_v52 = vld [vmem:[%s1312_s6 + $0x7b0] sm:$0xff]  ;;  %v413_v53 = vld [vmem:[%s1312_s6 + $0x7b8] sm:$0xff] }
  0xaf   : > { %902 = vst [vmem:[%s1335_s21 + $0x6f0] sm:$0xff] %v646_v7  ;;  %903 = vst [vmem:[%s1335_s21 + $0x6f8] sm:$0xff] %v647_v8  ;;  %v414_v54 = vld [vmem:[%s1312_s6 + $0x7c0] sm:$0xff]  ;;  %v670_v55 = vmul.f32 %v1319_v1, %v412_v52  ;;  %v671_v56 = vmul.f32 %v1319_v1, %v413_v53  ;;  %v415_v58 = vld [vmem:[%s1312_s6 + $0x7c8] sm:$0xff] }
  0xb0   : > { %904 = vst [vmem:[%s1335_s21 + $0x700] sm:$0xff] %v648_v9  ;;  %905 = vst [vmem:[%s1335_s21 + $0x708] sm:$0xff] %v649_v13  ;;  %v672_v57 = vmul.f32 %v1319_v1, %v414_v54  ;;  %v416_v59 = vld [vmem:[%s1312_s6 + $0x7d0] sm:$0xff]  ;;  %v417_v60 = vld [vmem:[%s1312_s6 + $0x7d8] sm:$0xff]  ;;  %v673_v61 = vmul.f32 %v1319_v1, %v415_v58 }
  0xb1   : > { %906 = vst [vmem:[%s1335_s21 + $0x710] sm:$0xff] %v650_v14  ;;  %907 = vst [vmem:[%s1335_s21 + $0x718] sm:$0xff] %v651_v15  ;;  %v674_v62 = vmul.f32 %v1319_v1, %v416_v59  ;;  %v675_v63 = vmul.f32 %v1319_v1, %v417_v60  ;;  %v418_v0 = vld [vmem:[%s1312_s6 + $0x7e0] sm:$0xff]  ;;  %v419_v2 = vld [vmem:[%s1312_s6 + $0x7e8] sm:$0xff] }
  0xb2   : > { %908 = vst [vmem:[%s1335_s21 + $0x720] sm:$0xff] %v652_v19  ;;  %909 = vst [vmem:[%s1335_s21 + $0x728] sm:$0xff] %v653_v20  ;;  %v420_v3 = vld [vmem:[%s1312_s6 + $0x7f0] sm:$0xff]  ;;  %v676_v4 = vmul.f32 %v1319_v1, %v418_v0  ;;  %v677_v5 = vmul.f32 %v1319_v1, %v419_v2  ;;  %v421_v7 = vld [vmem:[%s1312_s6 + $0x7f8] sm:$0xff] }
  0xb3   : > { %910 = vst [vmem:[%s1335_s21 + $0x730] sm:$0xff] %v654_v21  ;;  %911 = vst [vmem:[%s1335_s21 + $0x738] sm:$0xff] %v655_v25  ;;  %v678_v6 = vmul.f32 %v1319_v1, %v420_v3  ;;  %v679_v8 = vmul.f32 %v1319_v1, %v421_v7 }
  0xb4   : > { %912 = vst [vmem:[%s1335_s21 + $0x740] sm:$0xff] %v656_v26  ;;  %913 = vst [vmem:[%s1335_s21 + $0x748] sm:$0xff] %v657_v27 }
  0xb5   : > { %914 = vst [vmem:[%s1335_s21 + $0x750] sm:$0xff] %v658_v31  ;;  %915 = vst [vmem:[%s1335_s21 + $0x758] sm:$0xff] %v659_v32 }
  0xb6   : > { %916 = vst [vmem:[%s1335_s21 + $0x760] sm:$0xff] %v660_v33  ;;  %917 = vst [vmem:[%s1335_s21 + $0x768] sm:$0xff] %v661_v37 }
  0xb7   : > { %918 = vst [vmem:[%s1335_s21 + $0x770] sm:$0xff] %v662_v38  ;;  %919 = vst [vmem:[%s1335_s21 + $0x778] sm:$0xff] %v663_v39 }
  0xb8   : > { %920 = vst [vmem:[%s1335_s21 + $0x780] sm:$0xff] %v664_v43  ;;  %921 = vst [vmem:[%s1335_s21 + $0x788] sm:$0xff] %v665_v44 }
  0xb9   : > { %922 = vst [vmem:[%s1335_s21 + $0x790] sm:$0xff] %v666_v45  ;;  %923 = vst [vmem:[%s1335_s21 + $0x798] sm:$0xff] %v667_v49 }
  0xba   : > { %924 = vst [vmem:[%s1335_s21 + $0x7a0] sm:$0xff] %v668_v50  ;;  %925 = vst [vmem:[%s1335_s21 + $0x7a8] sm:$0xff] %v669_v51 }
  0xbb   : > { %926 = vst [vmem:[%s1335_s21 + $0x7b0] sm:$0xff] %v670_v55  ;;  %927 = vst [vmem:[%s1335_s21 + $0x7b8] sm:$0xff] %v671_v56 }
  0xbc   : > { %928 = vst [vmem:[%s1335_s21 + $0x7c0] sm:$0xff] %v672_v57  ;;  %929 = vst [vmem:[%s1335_s21 + $0x7c8] sm:$0xff] %v673_v61 }
  0xbd   : > { %930 = vst [vmem:[%s1335_s21 + $0x7d0] sm:$0xff] %v674_v62  ;;  %931 = vst [vmem:[%s1335_s21 + $0x7d8] sm:$0xff] %v675_v63 }
  0xbe   : > { %932 = vst [vmem:[%s1335_s21 + $0x7e0] sm:$0xff] %v676_v4  ;;  %933 = vst [vmem:[%s1335_s21 + $0x7e8] sm:$0xff] %v677_v5 }
  0xbf   : > { %934 = vst [vmem:[%s1335_s21 + $0x7f0] sm:$0xff] %v678_v6  ;;  %935 = vst [vmem:[%s1335_s21 + $0x7f8] sm:$0xff] %v679_v8 }
  0xc0   : > { %1135 = shalt.err (!%p1132_p9)
}
  0xc1   : > { %s1136_s18 = scalar_lea.hbm %s2087_s7, 32768  ;;  %s1140_s25 = scalar_lea.hbm %s2141_s2, 131072 }
  0xc2   : > { %p1137_p13 = scmp.ne.s32.totalorder %s2087_s7, %s1136_s18  ;;  %p1141_p2 = scmp.lt.s32.totalorder %s2087_s7, %s2141_s2 }
  0xc3   : > { %p1142_p3 = scmp.lt.s32.totalorder %s1140_s25, %s1136_s18 }
  0xc4   : > { %p1138_p1 = pnand %p1137_p13, %p2150_p11 }
  0xc5   : > { %p1143_p6 = por %p1142_p3, %p1141_p2 }
  0xc6   : > { %p1139_p0 = pneg %p1138_p1 }
  0xc8   : > { %p1144_p10 = pnand %p1143_p6, %p1139_p0 }
  0xca   : > { %1147 = shalt.err (!%p1144_p10)
}
  0xcb   : > { %s1192_s30 = smov 1024   ;;  %s1193_s6 = smov 64  }
  0xcc   : > { %1046 = dma.vmem_to_hbm [thread:$0]  (%p2150_p11), %s2089_s4, 32768, %s2087_s7, %s937_s8, %s1192_s30, %s1192_s30, %s1193_s6  }
  0xcd PF: > { %p1057_p12 = scmp.ge.s32.totalorder %s1186_s14, 2  ;;  %s966_s29 = sand.u32 1, %s1174_s11  }
  0xce   : > { %p2151_p4 = scmp.ne.s32.totalorder %s2147_s23, 0  ;;  %s967_s21 = scalar_lea.sflag [#allocation5], %s966_s29 }
  0xd0   : > { %p1053_p5 = pnand %p1057_p12, %p2151_p4 }
  0xd2   : > { %p1054_p7 = pneg %p1053_p5 }
  0xd4   : > { %1169 = dma.done.wait (%p1054_p7), %s967_s21, 32768  }
  0xd5   : > { %1171 = vsyncadd (%p1054_p7), %s967_s21, 4294934528  ;;  %p16_p8 = scmp.ge.s32.totalorder %s1237_s16, 6   ;;  %s2152_s11 = smov %s1178_s12 }
  0xd6   : > { %s2153_s12 = smov %s1182_s13  ;;  %s2154_s13 = smov %s1249_s19 }
  0xd7   : > { %s2155_s14 = smov %s1237_s16  ;;  %18 = sbr.rel (!%p16_p8) target bundleno = 7 (0x7), region = 73 }
  0xdc   :  { %972 = vsyncpa [#allocation4], 1 }
  0xdd   :  { %974 = vsyncpa [#allocation4 + $0x1], 1 }
  0xde   :  { %975 = vsyncpa [#allocation5], 1 }
  0xdf   :  { %977 = vsyncpa [#allocation5 + $0x1], 1 }

</bundles_post_ra>
